<compile_context>
chip_gen: v6e
topology: v6e:2x2x1
jax: 0.10.0
libtpu: 0.0.40
codegen_flags: <defaults>
</compile_context>

<pallas_src>
import functools
import math

import jax
import jax.numpy as jnp
from jax.experimental import pallas as pl
from jax.experimental.pallas import tpu as pltpu


def _round_up(x, n):
    return (x + n - 1) // n * n


def _tile_footprint_bytes(tile_b, tile_c, d, mm_bytes):
    """Double-buffered VMEM footprint estimate for one grid step."""
    return (2 * d * tile_c * mm_bytes          # W double buffer
            + 2 * tile_b * d * mm_bytes        # emb double buffer
            + 2 * tile_b * tile_c * 4          # out double buffer
            + 4 * 4 * (2 * tile_b + tile_c)    # inv_x / labels / inv_w
            + 2 * tile_b * tile_c * 4)         # f32 epilogue temporaries
    # (generous on purpose; used only to size vmem_limit / shrink tiles)


def _arcface_kernel(s, m, num_cj, flags_ref, emb_ref, w_ref, inv_x_ref,
                    inv_w_ref, label_ref, out_ref):
    s = float(s)
    s_cos_m = s * math.cos(m)
    s_sin_m = s * math.sin(m)

    i = pl.program_id(0)
    j = pl.program_id(1)
    tile_c = out_ref.shape[1]

    # Raw matmul on the MXU (bf16/f32 operands, f32 accumulation), then fold
    # in the precomputed row / column inverse L2 norms.
    raw = jnp.dot(emb_ref[...], w_ref[...],
                  preferred_element_type=jnp.float32)           # (TB, TC) f32
    cos = jnp.clip(raw * inv_x_ref[...] * inv_w_ref[...], -1.0, 1.0)
    base = cos * s

    flagged = flags_ref[i * num_cj + j] > 0

    # Additive-margin epilogue, only on tiles that contain a target column.
    # Exactly one store to out_ref per tile on either path.
    @pl.when(flagged)
    def _():
        # TODO(synk): labels stay as a (TB, 1) VMEM block (needed as a vector
        # operand for the lane-wise compare); only the per-tile flag lives in
        # SMEM via scalar prefetch.
        lab = label_ref[...]                                    # (TB, 1) i32
        col = j * tile_c + jax.lax.broadcasted_iota(jnp.int32, cos.shape, 1)
        mask = (col == lab) & (lab != -1)
        # Exact: cos(acos(c) + m) = c*cos(m) - sqrt(1 - c^2)*sin(m)
        sin_theta = jnp.sqrt(jnp.maximum(1.0 - cos * cos, 0.0))
        out_ref[...] = jnp.where(mask,
                                 cos * s_cos_m - sin_theta * s_sin_m,
                                 base)

    @pl.when(jnp.logical_not(flagged))
    def _():
        out_ref[...] = base


def arcface_forward(embeddings, weight, labels, *, s=64.0, m=0.5,
                    tile_b=512, tile_c=2048, matmul_dtype=jnp.bfloat16):
    """embeddings: (B, D) f32, weight: (D, C) f32, labels: (B,) int32."""
    B, D = embeddings.shape
    D2, C = weight.shape
    assert D == D2, "embedding dim mismatch"
    labels = labels.astype(jnp.int32)

    mm_bytes = jnp.dtype(matmul_dtype).itemsize
    # Sublane packing depends on operand dtype: f32->8, bf16->16, 8-bit->32.
    sublane = {4: 8, 2: 16, 1: 32}[mm_bytes]

    # Effective tile sizes honouring layout constraints and the problem size.
    tile_b = min(_round_up(tile_b, sublane), _round_up(B, sublane))
    tile_c = min(_round_up(tile_c, 128), _round_up(C, 128))

    # Generation-aware VMEM budget (v5e/v6e: 128 MiB, v7x: 64 MiB physical).
    try:
        phys_vmem = int(pltpu.get_tpu_info().vmem_capacity_bytes)
    except Exception:  # pragma: no cover - conservative fallback
        phys_vmem = 64 * 2 ** 20
    vmem_budget = int(0.7 * phys_vmem)

    # Shrink tiles (class dim first, then batch dim) until they fit.
    while (_tile_footprint_bytes(tile_b, tile_c, D, mm_bytes) > vmem_budget
           and tile_c > 128):
        tile_c = max(128, (tile_c // 2) // 128 * 128)
    while (_tile_footprint_bytes(tile_b, tile_c, D, mm_bytes) > vmem_budget
           and tile_b > sublane):
        tile_b = max(sublane, (tile_b // 2) // sublane * sublane)

    Bp = _round_up(B, tile_b)
    Cp = _round_up(C, tile_c)
    num_bi = Bp // tile_b
    num_cj = Cp // tile_c

    # Precompute inverse L2 norms once (hoisted out of the per-tile path).
    inv_x = jax.lax.rsqrt(
        jnp.sum(embeddings.astype(jnp.float32) ** 2, axis=1, keepdims=True))
    inv_w = jax.lax.rsqrt(
        jnp.sum(weight.astype(jnp.float32) ** 2, axis=0, keepdims=True))

    # Pad only when necessary (padding W / output costs extra HBM traffic).
    if Bp != B:
        emb_p = jnp.pad(embeddings, ((0, Bp - B), (0, 0)))
        inv_x_p = jnp.pad(inv_x, ((0, Bp - B), (0, 0)), constant_values=1.0)
        labels_p = jnp.pad(labels, (0, Bp - B), constant_values=-1)
    else:
        emb_p, inv_x_p, labels_p = embeddings, inv_x, labels
    if Cp != C:
        w_p = jnp.pad(weight, ((0, 0), (0, Cp - C)))
        inv_w_p = jnp.pad(inv_w, ((0, 0), (0, Cp - C)), constant_values=1.0)
    else:
        w_p, inv_w_p = weight, inv_w

    emb_mm = emb_p.astype(matmul_dtype)
    w_mm = w_p.astype(matmul_dtype)
    labels_2d = labels_p.reshape(Bp, 1)

    # Flat per-(batch tile, class tile) flag: does any valid label land here?
    # 1-D to avoid the 2-D SMEM padding blow-up.
    valid = labels != -1
    row_tile = jnp.arange(B, dtype=jnp.int32) // tile_b
    col_tile = jnp.clip(jnp.where(valid, labels, 0) // tile_c, 0, num_cj - 1)
    flat_idx = row_tile * num_cj + col_tile
    flags = jnp.zeros((num_bi * num_cj,), jnp.int32).at[flat_idx].add(
        valid.astype(jnp.int32))

    # Explicit VMEM limit from the actual tile footprint (within budget).
    footprint = _tile_footprint_bytes(tile_b, tile_c, D, mm_bytes)
    vmem_limit = int(min(vmem_budget,
                         max(32 * 2 ** 20, footprint + footprint // 2)))

    cost = pl.CostEstimate(
        flops=2 * Bp * D * Cp,
        bytes_accessed=(num_bi * D * Cp * mm_bytes     # W re-streamed per i
                        + Bp * D * mm_bytes            # embeddings
                        + Bp * Cp * 4),                # output
        transcendentals=0)

    kernel = functools.partial(_arcface_kernel, s, m, num_cj)

    out_full = pl.pallas_call(
        kernel,
        out_shape=jax.ShapeDtypeStruct((Bp, Cp), jnp.float32),
        grid_spec=pltpu.PrefetchScalarGridSpec(
            num_scalar_prefetch=1,
            grid=(num_bi, num_cj),
            in_specs=[
                pl.BlockSpec((tile_b, D), lambda i, j, flags: (i, 0)),
                pl.BlockSpec((D, tile_c), lambda i, j, flags: (0, j)),
                pl.BlockSpec((tile_b, 1), lambda i, j, flags: (i, 0)),
                pl.BlockSpec((1, tile_c), lambda i, j, flags: (0, j)),
                pl.BlockSpec((tile_b, 1), lambda i, j, flags: (i, 0)),
            ],
            out_specs=pl.BlockSpec((tile_b, tile_c),
                                   lambda i, j, flags: (i, j)),
        ),
        compiler_params=pltpu.CompilerParams(
            dimension_semantics=("parallel", "parallel"),
            vmem_limit_bytes=vmem_limit),
        cost_estimate=cost,
    )(flags, emb_mm, w_mm, inv_x_p, inv_w_p, labels_2d)

    if Bp == B and Cp == C:
        return out_full
    return out_full[:B, :C]


def _reference(embeddings, weight, labels, *, s=64.0, m=0.5):
    # Pure-JAX reference mirroring the PyTorch code (acos / cos path).
    x = embeddings / jnp.linalg.norm(embeddings, axis=1, keepdims=True)
    w = weight / jnp.linalg.norm(weight, axis=0, keepdims=True)
    cos = jnp.clip(x @ w, -1.0, 1.0)
    theta = jnp.arccos(cos)
    col = jnp.arange(cos.shape[1])[None, :]
    mask = (col == labels[:, None]) & (labels[:, None] != -1)
    theta = theta + jnp.where(mask, m, 0.0)
    return jnp.cos(theta) * s


if __name__ == "__main__":
    key = jax.random.PRNGKey(0)
    k_emb, k_w = jax.random.split(key)

    B, D, C = 8, 32, 384          # batch, in_features, out_features
    s_scale, margin = 64.0, 0.5

    embeddings = jax.random.normal(k_emb, (B, D), dtype=jnp.float32)
    # nn.init.normal_(kernel, std=0.01)
    weight = 0.01 * jax.random.normal(k_w, (D, C), dtype=jnp.float32)
    # Labels in [0, C); rows 2 and 5 have label == -1 (no margin applied).
    # With tile_c=128 the class tiles are [0,128), [128,256), [256,384);
    # the last tile has no labels so the pl.when skip path is exercised.
    labels = jnp.array([3, 17, -1, 42, 100, -1, 7, 200], dtype=jnp.int32)

    ref = _reference(embeddings, weight, labels, s=s_scale, m=margin)

    # Exact (f32 operand) path: tight tolerance, multi-tile C grid.
    out_f32 = arcface_forward(embeddings, weight, labels, s=s_scale, m=margin,
                              tile_c=128, matmul_dtype=jnp.float32)
    out_f32 = jax.block_until_ready(out_f32)
    assert out_f32.shape == (B, C) and out_f32.dtype == jnp.float32
    assert jnp.allclose(out_f32, ref, atol=2e-3, rtol=2e-3), "f32 mismatch"

    # Default bf16-operand path (v6e/v7x MXU friendly), f32 accumulation.
    # TODO(synk): bf16 operand error is amplified by sqrt(1-cos^2) when the
    # target-column |cos| -> 1; use matmul_dtype=f32 if exact margins matter.
    out_bf16 = arcface_forward(embeddings, weight, labels, s=s_scale,
                               m=margin, tile_c=128)
    out_bf16 = jax.block_until_ready(out_bf16)
    assert out_bf16.shape == (B, C) and out_bf16.dtype == jnp.float32
    assert jnp.allclose(out_bf16, ref, atol=0.5, rtol=0.02), "bf16 mismatch"

    # Default (large-tile) path: single class tile, exercises the
    # no-pad / no-slice fast path clamping and the VMEM-budget logic.
    out_def = arcface_forward(embeddings, weight, labels, s=s_scale, m=margin)
    out_def = jax.block_until_ready(out_def)
    assert out_def.shape == (B, C)
    assert jnp.allclose(out_def, ref, atol=0.5, rtol=0.02), "default mismatch"

    print("KERNEL_OK")
</pallas_src>

<mosaic_0001>
module attributes {stable_mosaic.version = 11 : i64} {
  func.func @_arcface_kernel(%arg0: i32, %arg1: i32, %arg2: memref<3xi32, #tpu.memory_space<smem>>, %arg3: memref<8x32xf32, #tpu.memory_space<vmem>>, %arg4: memref<32x128xf32, #tpu.memory_space<vmem>>, %arg5: memref<8x1xf32, #tpu.memory_space<vmem>>, %arg6: memref<1x128xf32, #tpu.memory_space<vmem>>, %arg7: memref<8x1xi32, #tpu.memory_space<vmem>>, %arg8: memref<8x128xf32, #tpu.memory_space<vmem>>) attributes {dimension_semantics = [#tpu.dimension_semantics<parallel>, #tpu.dimension_semantics<parallel>], iteration_bounds = array<i64: 1, 3>, scalar_prefetch = 1 : i64, scratch_operands = 0 : i64, tpu.core_type = #tpu.core_type<tc>, window_params = [{transform_indices = @transform_0, window_bounds = array<i64: 8, 32>}, {transform_indices = @transform_1, window_bounds = array<i64: 32, 128>}, {transform_indices = @transform_2, window_bounds = array<i64: 8, 1>}, {transform_indices = @transform_3, window_bounds = array<i64: 1, 128>}, {transform_indices = @transform_4, window_bounds = array<i64: 8, 1>}, {transform_indices = @transform_5, window_bounds = array<i64: 8, 128>}]} {
    %c0 = arith.constant 0 : index
    %c0_0 = arith.constant 0 : index
    %0 = vector.load %arg3[%c0, %c0_0] : memref<8x32xf32, #tpu.memory_space<vmem>>, vector<8x32xf32>
    %c0_1 = arith.constant 0 : index
    %c0_2 = arith.constant 0 : index
    %1 = vector.load %arg4[%c0_1, %c0_2] : memref<32x128xf32, #tpu.memory_space<vmem>>, vector<32x128xf32>
    %cst = arith.constant dense<0.000000e+00> : vector<8x128xf32>
    %2 = tpu.matmul %0, %1, %cst {dimension_numbers = #tpu.dot_dimension_numbers<[1], [0], [0], [1], [0, 0, 1, 1], [], []>} : vector<8x32xf32>, vector<32x128xf32>, vector<8x128xf32> -> vector<8x128xf32>
    %c0_3 = arith.constant 0 : index
    %c0_4 = arith.constant 0 : index
    %3 = vector.load %arg5[%c0_3, %c0_4] : memref<8x1xf32, #tpu.memory_space<vmem>>, vector<8x1xf32>
    %4 = vector.broadcast %3 : vector<8x1xf32> to vector<8x128xf32>
    %5 = arith.mulf %2, %4 : vector<8x128xf32>
    %c0_5 = arith.constant 0 : index
    %c0_6 = arith.constant 0 : index
    %6 = vector.load %arg6[%c0_5, %c0_6] : memref<1x128xf32, #tpu.memory_space<vmem>>, vector<1x128xf32>
    %7 = vector.broadcast %6 : vector<1x128xf32> to vector<8x128xf32>
    %8 = arith.mulf %5, %7 : vector<8x128xf32>
    %cst_7 = arith.constant -1.000000e+00 : f32
    %cst_8 = arith.constant 1.000000e+00 : f32
    %9 = vector.broadcast %cst_7 : f32 to vector<8x128xf32>
    %10 = arith.maximumf %9, %8 : vector<8x128xf32>
    %11 = vector.broadcast %cst_8 : f32 to vector<8x128xf32>
    %12 = arith.minimumf %11, %10 : vector<8x128xf32>
    %cst_9 = arith.constant 6.400000e+01 : f32
    %13 = vector.broadcast %cst_9 : f32 to vector<8x128xf32>
    %14 = arith.mulf %12, %13 : vector<8x128xf32>
    %c3_i32 = arith.constant 3 : i32
    %15 = arith.muli %arg0, %c3_i32 : i32
    %16 = arith.addi %15, %arg1 : i32
    %17 = arith.index_cast %16 : i32 to index
    %18 = memref.load %arg2[%17] : memref<3xi32, #tpu.memory_space<smem>>
    %c0_i32 = arith.constant 0 : i32
    %19 = arith.cmpi sgt, %18, %c0_i32 : i32
    %20 = arith.extui %19 : i1 to i32
    %c0_i32_10 = arith.constant 0 : i32
    %21 = arith.cmpi ne, %20, %c0_i32_10 : i32
    scf.if %21 {
      %c0_12 = arith.constant 0 : index
      %c0_13 = arith.constant 0 : index
      %25 = vector.load %arg7[%c0_12, %c0_13] : memref<8x1xi32, #tpu.memory_space<vmem>>, vector<8x1xi32>
      %c128_i32 = arith.constant 128 : i32
      %26 = arith.muli %arg1, %c128_i32 : i32
      %27 = tpu.iota {dimensions = array<i32: 1>} : vector<8x128xi32>
      %28 = vector.broadcast %26 : i32 to vector<8x128xi32>
      %29 = arith.addi %28, %27 : vector<8x128xi32>
      %30 = vector.broadcast %25 : vector<8x1xi32> to vector<8x128xi32>
      %31 = arith.cmpi eq, %29, %30 : vector<8x128xi32>
      %c-1_i32 = arith.constant -1 : i32
      %32 = vector.broadcast %c-1_i32 : i32 to vector<8x1xi32>
      %33 = arith.cmpi ne, %25, %32 : vector<8x1xi32>
      %34 = vector.broadcast %33 : vector<8x1xi1> to vector<8x128xi1>
      %35 = arith.andi %31, %34 : vector<8x128xi1>
      %36 = arith.mulf %12, %12 : vector<8x128xf32>
      %cst_14 = arith.constant 1.000000e+00 : f32
      %37 = vector.broadcast %cst_14 : f32 to vector<8x128xf32>
      %38 = arith.subf %37, %36 : vector<8x128xf32>
      %cst_15 = arith.constant 0.000000e+00 : f32
      %39 = vector.broadcast %cst_15 : f32 to vector<8x128xf32>
      %40 = arith.maximumf %38, %39 : vector<8x128xf32>
      %41 = math.sqrt %40 : vector<8x128xf32>
      %cst_16 = arith.constant 56.1652832 : f32
      %42 = vector.broadcast %cst_16 : f32 to vector<8x128xf32>
      %43 = arith.mulf %12, %42 : vector<8x128xf32>
      %cst_17 = arith.constant 30.6832352 : f32
      %44 = vector.broadcast %cst_17 : f32 to vector<8x128xf32>
      %45 = arith.mulf %41, %44 : vector<8x128xf32>
      %46 = arith.subf %43, %45 : vector<8x128xf32>
      %47 = arith.select %35, %46, %14 : vector<8x128xi1>, vector<8x128xf32>
      %c0_18 = arith.constant 0 : index
      %c0_19 = arith.constant 0 : index
      %48 = vector.load %arg8[%c0_18, %c0_19] : memref<8x128xf32, #tpu.memory_space<vmem>>, vector<8x128xf32>
      tpu.vector_store %arg8[%c0_18, %c0_19], %47 {strides = array<i32>} : memref<8x128xf32, #tpu.memory_space<vmem>>, vector<8x128xf32>,
    } else {
    }
    %true = arith.constant true
    %22 = arith.xori %19, %true : i1
    %23 = arith.extui %22 : i1 to i32
    %c0_i32_11 = arith.constant 0 : i32
    %24 = arith.cmpi ne, %23, %c0_i32_11 : i32
    scf.if %24 {
      %c0_12 = arith.constant 0 : index
      %c0_13 = arith.constant 0 : index
      %25 = vector.load %arg8[%c0_12, %c0_13] : memref<8x128xf32, #tpu.memory_space<vmem>>, vector<8x128xf32>
      tpu.vector_store %arg8[%c0_12, %c0_13], %14 {strides = array<i32>} : memref<8x128xf32, #tpu.memory_space<vmem>>, vector<8x128xf32>,
    } else {
    }
    return
  }
  func.func @transform_0(%arg0: i32, %arg1: i32, %arg2: memref<3xi32, #tpu.memory_space<smem>>) -> (i32, i32) {
    %c0_i32 = arith.constant 0 : i32
    %c0_i32_0 = arith.constant 0 : i32
    return %arg0, %c0_i32 : i32, i32
  }
  func.func @transform_1(%arg0: i32, %arg1: i32, %arg2: memref<3xi32, #tpu.memory_space<smem>>) -> (i32, i32) {
    %c0_i32 = arith.constant 0 : i32
    %c0_i32_0 = arith.constant 0 : i32
    return %c0_i32, %arg1 : i32, i32
  }
  func.func @transform_2(%arg0: i32, %arg1: i32, %arg2: memref<3xi32, #tpu.memory_space<smem>>) -> (i32, i32) {
    %c0_i32 = arith.constant 0 : i32
    %c0_i32_0 = arith.constant 0 : i32
    return %arg0, %c0_i32 : i32, i32
  }
  func.func @transform_3(%arg0: i32, %arg1: i32, %arg2: memref<3xi32, #tpu.memory_space<smem>>) -> (i32, i32) {
    %c0_i32 = arith.constant 0 : i32
    %c0_i32_0 = arith.constant 0 : i32
    return %c0_i32, %arg1 : i32, i32
  }
  func.func @transform_4(%arg0: i32, %arg1: i32, %arg2: memref<3xi32, #tpu.memory_space<smem>>) -> (i32, i32) {
    %c0_i32 = arith.constant 0 : i32
    %c0_i32_0 = arith.constant 0 : i32
    return %arg0, %c0_i32 : i32, i32
  }
  func.func @transform_5(%arg0: i32, %arg1: i32, %arg2: memref<3xi32, #tpu.memory_space<smem>>) -> (i32, i32) {
    %c0_i32 = arith.constant 0 : i32
    return %arg0, %arg1 : i32, i32
  }
}

</mosaic_0001>

<bundles_post_ra>
// kernel: tpu_custom_call.1
= control target key start
LH: loop header
LB: loop body
LE: loop exit
PB: predicated region body
PF: predicated region fallthrough
CT: control target
= control target key end

     0   :  { %s1059_s0 = inlined_call_operand.vmem [shape: s32[3], index: 0, kind: input, shape index: {}]   ;;  %s1060_s1 = inlined_call_operand.vmem [shape: f32[8,32], index: 1, kind: input, shape index: {}]   ;;  %s1061_s2 = inlined_call_operand.hbm [shape: f32[32,384], index: 2, kind: input, shape index: {}]   ;;  %s1062_s3 = inlined_call_operand.vmem [shape: f32[8,1], index: 3, kind: input, shape index: {}]   ;;  %s1063_s4 = inlined_call_operand.vmem [shape: f32[1,384], index: 4, kind: input, shape index: {}]   ;;  %s1064_s5 = inlined_call_operand.vmem [shape: s32[8,1], index: 5, kind: input, shape index: {}]   ;;  %s1065_s6 = inlined_call_operand.hbm [shape: f32[8,384], index: 6, kind: output, shape index: {}]  }
   0x1   :  { %s11_s23 = sshll.u32 %s1059_s0, 4  ;;  %s12_s23 = int_to_ptr.vmem [resolvable:$true] %s11_s23 }
   0x2   :  { %s731_s24 = scalar_lea.vmem %s12_s23, 16  ;;  %p736_p1 = scmp.lt.s32.totalorder %s12_s23, %s12_s23 }
   0x3   :  { %p732_p0 = scmp.ne.s32.totalorder %s12_s23, %s731_s24  ;;  %p737_p2 = scmp.lt.s32.totalorder %s731_s24, %s731_s24 }
   0x5   :  { %p738_p3 = por %p737_p2, %p736_p1 }
   0x7   :  { %p739_p4 = pnand %p738_p3, %p732_p0 }
   0x9   :  { %742 = shalt.err (!%p739_p4)  }
   0xa   :  { %s855_s25 = smov [#allocation3]  }
   0xb   :  { %14 = dma.vmem_to_smem %s12_s23, 16, %s855_s25, [#allocation2] }
   0xc   :  { %821 = dma.done.wait [#allocation2], 16 }
   0xd   :  { %822 = vsyncadd [#allocation2], 4294967280 }
   0xe   :  { %16 = sfence }
   0xf   :  { %17 = vsyncpa [#allocation5], 0 }
  0x10   :  { %19 = vsyncpa [#allocation5 + $0x1], 0 }
  0x11   :  { %20 = vsyncpa [#allocation6], 0 }
  0x12   :  { %22 = vsyncpa [#allocation6 + $0x1], 0  ;;  %s903_s26 = smov 0   ;;  %s905_s0 = smov 0  }
  0x13   :  { %s907_s27 = smov 0   ;;  %s909_s28 = smov 0  }
  0x14   :  { %s911_s29 = smov 0   ;;  %s913_s30 = smov 0  }
  0x15 LB: > { %s619_s7 = sadd.s32 4294967295, %s853_s30   ;;  %s620_s8 = sadd.s32 4294967294, %s853_s30   ;;  %s853_s30 = sphi %s913_s30, %s28_s30   ;;  %s849_s29 = sphi %s911_s29, %s1075_s29   ;;  %s845_s28 = sphi %s909_s28, %s1074_s28   ;;  %s841_s27 = sphi %s907_s27, %s1073_s27   ;;  %s837_s0 = sphi %s905_s0, %s1072_s0   ;;  %s833_s26 = sphi %s903_s26, %s1071_s26  }
  0x16   : > { %s37_s9 = sadd.s32 1, %s849_s29  ;;  %s73_s10 = sadd.s32 1, %s841_s27 }
  0x17   : > { %p38_p5 = scmp.ge.s32.totalorder %s37_s9, 3  ;;  %p80_p6 = scmp.ne.s32.totalorder %s841_s27, %s837_s0 }
  0x18   : > { %p81_p7 = scmp.eq.s32.totalorder %s853_s30, 0  ;;  %p86_p8 = scmp.ne.s32.totalorder %s837_s0, %s833_s26 }
  0x19   : > { %s1077_s9 = smov (%p38_p5, %s37_s9), 0  ;;  %p87_p10 = scmp.eq.s32.totalorder %s619_s7, 0 }
  0x1a   : > { %p944_p9 = por %p81_p7, %p80_p6  ;;  %s70_s12 = ssub.s32 %s849_s29, %s1077_s9 }
  0x1b   : > { %p190_p11 = scmp.eq.s32.totalorder %s619_s7, 2  ;;  %p71_p12 = scmp.eq.s32.totalorder %s70_s12, 0 }
  0x1c   : > { %p950_p13 = por %p87_p10, %p86_p8  ;;  %p196_p1 = scmp.eq.s32.totalorder %s620_s8, 2 }
  0x1d   : > { %p954_p0 = por %p190_p11, %p80_p6  ;;  %p669_p3 = scmp.lt.s32.totalorder %s853_s30, 3 }
  0x1e   : > { %s959_s15 = scalar_select %p71_p12, %s841_s27, %s73_s10  }
  0x1f   : > { %p961_p2 = por %p196_p1, %p86_p8  ;;  %s237_s17 = sand.u32 1, %s841_s27  }
  0x20   : > { %s626_s18 = sshll.u32 %s237_s17, 5  ;;  %s627_s19 = sshll.u32 %s849_s29, 7 }
  0x21   : > { %s246_s22 = scalar_lea.hbm %s1061_s2, %s627_s19  ;;  %s241_s23 = scalar_lea.vmem [#allocation4], %s626_s18 }
  0x22   : > { %s247_s24 = sshll.u32 %s241_s23, 4  ;;  %p973_p4 = pnand %p669_p3, %p944_p9  ;;  %s248_s24 = int_to_ptr.vmem [resolvable:$true] %s247_s24 }
  0x23   : > { %s238_s7 = scalar_lea.sflag [#allocation5], %s237_s17  ;;  %s756_s8 = scalar_lea.vmem %s248_s24, 512 }
  0x24   : > { %p745_p5 = pneg %p973_p4  ;;  %p757_p6 = scmp.ne.s32.totalorder %s248_s24, %s756_s8 }
  0x25   : > { %s856_s10 = smov [#allocation4]  }
  0x26   : > { %p759_p7 = pnand %p757_p6, %p745_p5  ;;  %s761_s12 = sshll.u32 %s856_s10, 4  ;;  %s762_s12 = int_to_ptr.vmem [resolvable:$false] %s761_s12 }
  0x27   : > { %s763_s19 = scalar_lea.vmem %s762_s12, 1024  ;;  %p764_p10 = scmp.lt.s32.totalorder %s248_s24, %s762_s12 }
  0x28   : > { %p760_p8 = pneg %p759_p7  ;;  %p765_p11 = scmp.lt.s32.totalorder %s763_s19, %s756_s8 }
  0x2a   : > { %p766_p12 = por %p765_p11, %p764_p10 }
  0x2c   : > { %p767_p1 = pnand %p766_p12, %p760_p8 }
  0x2e   : > { %770 = shalt.err (!%p767_p1)
}
  0x2f   : > { %s857_s11 = smov 384   ;;  %s858_s17 = smov 128  }
  0x30   : > { %s859_s18 = smov 8   ;;  %p628_p9 = scmp.ge.s32.totalorder %s853_s30, 1 }
  0x31   : > { %664 = dma.hbm_to_vmem [thread:$0]  (!%p973_p4), %s246_s22, 512, %s248_s24, %s238_s7, %s857_s11, %s858_s17, %s859_s18  }
  0x32   : > { %p261_p3 = scmp.lt.s32.totalorder %s853_s30, 4 }
  0x34   : > { %p262_p5 = pnand %p628_p9, %p261_p3 }
  0x35   : > { %s984_s20 = sand.u32 (!%p262_p5), 1, %s837_s0  }
  0x36   : > { %265 = sbr.rel (%p262_p5) target bundleno = 434 (0x1b2), region = 40  ;;  %s629_s21 = sshll.u32 (!%p262_p5), %s984_s20, 5 }
  0x37   : > { %s268_s23 = scalar_lea.sflag (!%p262_p5), [#allocation5], %s984_s20  ;;  %s271_s8 = scalar_lea.vmem (!%p262_p5), [#allocation4], %s629_s21 }
  0x3b   : > { %824 = dma.done.wait (%p950_p13), %s268_s23, 512  }
  0x3c   : > { %826 = vsyncadd (%p950_p13), %s268_s23, 4294966784  ;;  %s630_s22 = sshll.u32 %s984_s20, 3  ;;  %s994_s24 = sld [smem:[#allocation3 + %s845_s28]]  ;;  %v860_v0 = vmov 0.0   ;;  %vm861_vm0 = vmmov 0   ;;  %v862_v1 = vmov 0  }
  0x3d   : > { %646 = vmatprep.subr.mxu0 %v860_v0  ;;  %654 = vmatprep.mubr.msk.f32.mxu0 %vm861_vm0, %v860_v0  ;;  %v332_v2 = vld [vmem:[%s271_s8 + $0x18] sm:$0xff]  ;;  %v331_v3 = vld [vmem:[%s271_s8 + $0x10] sm:$0xff]  ;;  %v407_v4 = vld [vmem:[%s1062_s3] sm:$0xff]  ;;  %vm333_vm1 = vcmask 261120   ;;  %p321_p13 = scmp.lt.s32.totalorder %s845_s28, 2  ;;  %s1009_s18 = scalar_lea.vmem [#allocation7], %s630_s22 }
  0x3e   : > { %727 = vset.pattern.permute.xlu0 %v862_v1  ;;  %647 = vmatpush3.msra.mxu0 %v332_v2  ;;  %v330_v5 = vld [vmem:[%s271_s8 + $0x8] sm:$0xff]  ;;  %v329_v6 = vld [vmem:[%s271_s8] sm:$0xff] }
  0x3f   : > { %648 = vmatprep.subr.mxu0 %v860_v0  ;;  %410 = vperm.xlu0 %727, %v407_v4   ;;  %v328_v7 = vld [vmem:[%s1060_s1] sm:$0xff]  ;;  %s322_s12 = scalar_select %p321_p13, %s845_s28, 2 }
  0x40   : > { %649 = vmatpush3.msra.mxu0 %v331_v3 }
  0x41   : > { %650 = vmatprep.subr.mxu0 %v860_v0  ;;  %s323_s17 = scalar_lea.vmem %s1063_s4, %s322_s12 }
  0x42   : > { %651 = vmatpush3.msra.mxu0 %v330_v5  ;;  %v632_v10 = vld [vmem:[%s323_s17] ss:$0 sm:$0xff]  ;;  %p634_p4 = scmp.le.s32.totalorder %s994_s24, 0 }
  0x43   : > { %652 = vmatprep.subr.mxu0 %v860_v0  ;;  %s635_s8 = sshll.u32 (!%p634_p4), %s845_s28, 7 }
  0x44   : > { %653 = vmatpush3.msra.mxu0 %v329_v6 }
  0x45   : > { %655 = vmatmul.mubr.msk.f32.vlgmr.msra.gmra.mxu0 %vm333_vm1, %v328_v7 }
  0xba   : > { %v411_v8 = vpop.permute.xlu0 %410 }
 0x105   : > { %v403_v9 = vpop.f32.mrf.mxu0 }
 0x106   : > { %v413_v11 = vmul.f32 %v411_v8, %v403_v9 }
 0x107   : > { %v656_v12 = vpop.f32.mrf.mxu0 }
 0x108   : > { %v421_v13 = vmul.f32 %v632_v10, %v413_v11  ;;  %431 = sbr.rel (%p634_p4) target bundleno = 403 (0x193), region = 48 }
 0x10a   : > { %v633_v14 = vclamps-f32 %v421_v13, 1.0 }
 0x10c   : > { %v424_v15 = vmul.f32 64.0, %v633_v14 }
 0x10d   : > { %v432_v16 = vld [vmem:[%s1064_s5] sm:$0xff]  ;;  %v863_v17 = vmov 0   ;;  %v449_v19 = vmul.f32 %v633_v14, %v633_v14  ;;  %v434_v25 = vlaneseq  ;;  %v436_v29 = vstv %s635_s8 }
 0x10e   : > { %728 = vset.pattern.permute.xlu0 %v863_v17  ;;  %vm442_vm2 = vcmp.ne.s32.totalorder %v432_v16, 4294967295  ;;  %v459_v30 = vmul.f32 56.165283, %v633_v14 }
 0x10f   : > { %439 = vperm.xlu0 %728, %v432_v16   ;;  %v443_v18 = vsel %vm442_vm2, 1, %v863_v17  ;;  %v450_v20 = vsub.f32 1.0, %v449_v19  ;;  %v435_v28 = vand.u32 127, %v434_v25 }
 0x111   : > { %v451_v21 = vmax.f32 %v450_v20, 0.0  ;;  %v437_v33 = vadd.s32 %v436_v29, %v435_v28 }
 0x113   : > { %445 = vperm.xlu0 %728, %v443_v18   ;;  %729 = vrsqrt.f32 %v451_v21  ;;  %vm454_vm3 = vcmp.eq.f32.partialorder %v451_v21, inf  ;;  %v457_v24 = vand.u32 2147483648, %v451_v21  ;;  %vm456_vm4 = vcmp.eq.f32.partialorder %v451_v21, 0.0 }
 0x120   : > { %v730_v22 = vpop.eup %729 }
 0x121   : > { %v453_v23 = vmul.f32 %v730_v22, %v451_v21 }
 0x123   : > { %v455_v26 = vsel %vm454_vm3, %v451_v21, %v453_v23 }
 0x124   : > { %v458_v27 = vsel %vm456_vm4, %v457_v24, %v455_v26 }
 0x125   : > { %v460_v31 = vmul.f32 30.683235, %v458_v27 }
 0x127   : > { %v461_v34 = vsub.f32 %v459_v30, %v460_v31 }
 0x18a   : > { %v440_v32 = vpop.permute.xlu0 %439 }
 0x18b   : > { %vm441_vm5 = vcmp.eq.s32.totalorder %v437_v33, %v440_v32 }
 0x18e   : > { %v446_v35 = vpop.permute.xlu0 %445 }
 0x18f   : > { %vm447_vm6 = vcmp.eq.s32.totalorder %v446_v35, 1 }
 0x190   : > { %vm448_vm7 = vmand %vm441_vm5, %vm447_vm6 }
 0x191   : > { %v462_v36 = vsel %vm448_vm7, %v461_v34, %v424_v15 }
 0x192   : > { %463 = vst [vmem:[%s1009_s18] sm:$0xff] %v462_v36 }
 0x193 PF: > { %p636_p6 = scmp.gt.s32.totalorder %s994_s24, 0 }
 0x195   : > { %467 = sbr.rel (%p636_p6) target bundleno = 411 (0x19b), region = 52 }
 0x19a   : > { %468 = vst [vmem:[%s1009_s18] sm:$0xff] %v424_v15 }
 0x19b PF: > { %s638_s22 = sshll.u32 %s845_s28, 7  ;;  %s485_s10 = sshll.u32 %s1009_s18, 4  ;;  %s486_s10 = int_to_ptr.vmem [resolvable:$true] %s485_s10 }
 0x19c   : > { %s483_s13 = scalar_lea.hbm %s1065_s6, %s638_s22  ;;  %s470_s12 = scalar_lea.sflag [#allocation6], %s984_s20 }
 0x19d   : > { %s771_s19 = scalar_lea.vmem %s486_s10, 128  ;;  %s864_s24 = smov [#allocation7]  }
 0x19e   : > { %p772_p7 = scmp.ne.s32.totalorder %s486_s10, %s771_s19  ;;  %s775_s11 = sshll.u32 %s864_s24, 4  ;;  %s776_s11 = int_to_ptr.vmem [resolvable:$false] %s775_s11 }
 0x19f   : > { %s777_s17 = scalar_lea.vmem %s776_s11, 256  ;;  %p778_p11 = scmp.lt.s32.totalorder %s486_s10, %s776_s11 }
 0x1a0   : > { %p773_p8 = pnand %p772_p7, %p954_p0  ;;  %p779_p12 = scmp.lt.s32.totalorder %s777_s17, %s771_s19 }
 0x1a2   : > { %p774_p10 = pneg %p773_p8  ;;  %p780_p1 = por %p779_p12, %p778_p11 }
 0x1a4   : > { %p781_p9 = pnand %p780_p1, %p774_p10 }
 0x1a6   : > { %784 = shalt.err (!%p781_p9)
}
 0x1a7   : > { %s785_s28 = scalar_lea.hbm %s483_s13, 128  ;;  %s789_s21 = scalar_lea.hbm %s1065_s6, 384 }
 0x1a8   : > { %p786_p3 = scmp.ne.s32.totalorder %s483_s13, %s785_s28  ;;  %p790_p4 = scmp.lt.s32.totalorder %s483_s13, %s1065_s6 }
 0x1a9   : > { %p791_p6 = scmp.lt.s32.totalorder %s789_s21, %s785_s28 }
 0x1aa   : > { %p787_p5 = pnand %p786_p3, %p954_p0 }
 0x1ab   : > { %p792_p7 = por %p791_p6, %p790_p4 }
 0x1ac   : > { %p788_p13 = pneg %p787_p5 }
 0x1ae   : > { %p793_p8 = pnand %p792_p7, %p788_p13 }
 0x1b0   : > { %796 = shalt.err (!%p793_p8)
}
 0x1b1   : > { %659 = dma.vmem_to_hbm [thread:$0]  (%p954_p0), %s486_s10, 128, %s483_s13, %s470_s12  }
 0x1b2 PF: > { %p670_p10 = scmp.ge.s32.totalorder %s853_s30, 2  ;;  %s497_s22 = sand.u32 1, %s833_s26  }
 0x1b3   : > { %s498_s25 = scalar_lea.sflag [#allocation6], %s497_s22 }
 0x1b4   : > { %p666_p11 = pnand %p670_p10, %p961_p2 }
 0x1b6   : > { %p667_p12 = pneg %p666_p11 }
 0x1b8   : > { %828 = dma.done.wait (%p667_p12), %s498_s25, 128  }
 0x1b9   : > { %830 = vsyncadd (%p667_p12), %s498_s25, 4294967168  ;;  %s28_s30 = sadd.s32 1, %s853_s30   ;;  %s1071_s26 = smov %s837_s0 }
 0x1ba   : > { %p25_p1 = scmp.ge.s32.totalorder %s28_s30, 5   ;;  %s1072_s0 = smov %s841_s27 }
 0x1bb   : > { %s1073_s27 = smov %s959_s15  ;;  %s1074_s28 = smov %s849_s29 }
 0x1bc   : > { %s1075_s29 = smov %s1077_s9  ;;  %27 = sbr.rel (!%p25_p1) target bundleno = 21 (0x15), region = 105 }
 0x1c1   :  { %503 = vsyncpa [#allocation5], 1 }
 0x1c2   :  { %505 = vsyncpa [#allocation5 + $0x1], 1 }
 0x1c3   :  { %506 = vsyncpa [#allocation6], 1 }
 0x1c4   :  { %508 = vsyncpa [#allocation6 + $0x1], 1 }

</bundles_post_ra>
